<compile_context>
chip_gen: v5e
topology: v5e:2x2
jax: 0.10.0
libtpu: 0.0.40
codegen_flags: <defaults>
</compile_context>

<pallas_src>
import jax
import jax.numpy as jnp
from jax import lax
from jax.experimental import pallas as pl
from jax.experimental.pallas import tpu as pltpu

_LANE = 128
_SUBLANE = 8


def _round_up(x, m):
    return (x + m - 1) // m * m


def _cdiv(a, b):
    return (a + b - 1) // b


def _proto_mlp_kernel(ids_ref,                          # (TB, 1) int32, VMEM
                      emb_ref,                          # (n_rows_pad, F_pad) bf16, resident
                      w1_ref, b1_ref, w2_ref, b2_ref,   # resident params
                      o_ref):                           # (TB, F_pad) f32 output tile
    tb = o_ref.shape[0]
    n_rows_pad = emb_ref.shape[0]

    # ---- embedding gather as a one-hot bf16 MXU matmul ----------------------
    ids = ids_ref[...]                                              # (TB, 1) int32
    cols = lax.broadcasted_iota(jnp.int32, (tb, n_rows_pad), 1)     # (TB, R)
    onehot = (cols == ids).astype(jnp.bfloat16)                     # exact 0/1
    emb = jnp.dot(onehot, emb_ref[...],
                  preferred_element_type=jnp.float32)               # (TB, F) == gathered rows

    # ---- MLP: bf16 matmuls on the MXU, f32 accumulation / epilogue ----------
    h = jnp.dot(emb.astype(jnp.bfloat16), w1_ref[...],
                preferred_element_type=jnp.float32)                 # (TB, H)
    h = jnp.maximum(h + b1_ref[...], 0.0)
    z = jnp.dot(h.astype(jnp.bfloat16), w2_ref[...],
                preferred_element_type=jnp.float32) + b2_ref[...]   # (TB, F)

    # F.normalize(z, p=2, dim=1): z / max(||z||, eps) == z * rsqrt(max(sumsq, eps^2))
    sumsq = jnp.sum(z * z, axis=-1, keepdims=True)
    o_ref[...] = z * lax.rsqrt(jnp.maximum(sumsq, 1e-24))


def trainable_prototypes_forward(class_id, emb_table, w1, b1, w2, b2, *, tile_b=None):
    """Forward pass of Trainable_prototypes.

    class_id : int scalar or int array of shape (B,)
    emb_table: (num_classes*3, feature_dim) f32
    w1: (feature_dim, server_hidden_dim) f32     b1: (server_hidden_dim,) f32
    w2: (server_hidden_dim, feature_dim) f32     b2: (feature_dim,) f32
    returns  : (B, feature_dim) f32, rows L2-normalized (B == 1 for scalar input)
    """
    class_id = jnp.asarray(class_id, dtype=jnp.int32)
    ids = class_id.reshape((1,)) if class_id.ndim == 0 else class_id.reshape((-1,))
    B = ids.shape[0]

    n_rows, F = emb_table.shape
    H = w1.shape[1]
    # Note (v6e): for real dims > 128 padding K/N to 256 better fills the 2x256^2
    # MXU; kept at 128 here since example dims are <= 128 (and 128 is right for v5e).
    F_pad = _round_up(F, _LANE)
    H_pad = _round_up(H, _LANE)
    R_pad = _round_up(n_rows, _SUBLANE)

    # TODO(synk): if the padded table (R_pad * F_pad bf16) ever exceeds the VMEM
    # budget (very large num_classes * feature_dim), fall back to a
    # double-buffered manual-DMA gather instead of the resident one-hot path.

    # --- batch tiling --------------------------------------------------------
    if tile_b is None:
        B_r = _round_up(B, _SUBLANE)
        if B_r <= 512:
            tile_b = B_r                       # single grid step, no per-step overhead
        else:
            n_tiles = _cdiv(B_r, 512)          # even number of ~512-row tiles
            if n_tiles % 2:
                n_tiles += 1
            tile_b = _round_up(_cdiv(B_r, n_tiles), _SUBLANE)
    tile_b = max(_SUBLANE, _round_up(tile_b, _SUBLANE))
    B_pad = _round_up(B, tile_b)
    grid = (B_pad // tile_b,)

    # Clamp ids (jnp.take-style clamping); padded batch rows gather row 0 and
    # are sliced off below.
    ids = jnp.clip(ids, 0, n_rows - 1)
    ids_2d = jnp.pad(ids, (0, B_pad - B)).reshape(B_pad, 1)

    # Zero-pad so padded lanes / padded table rows contribute exactly zero.
    emb_p = jnp.pad(emb_table.astype(jnp.float32),
                    ((0, R_pad - n_rows), (0, F_pad - F))).astype(jnp.bfloat16)
    w1_p = jnp.pad(w1.astype(jnp.float32),
                   ((0, F_pad - F), (0, H_pad - H))).astype(jnp.bfloat16)
    w2_p = jnp.pad(w2.astype(jnp.float32),
                   ((0, H_pad - H), (0, F_pad - F))).astype(jnp.bfloat16)
    b1_p = jnp.pad(b1.reshape(1, -1).astype(jnp.float32), ((0, 0), (0, H_pad - H)))
    b2_p = jnp.pad(b2.reshape(1, -1).astype(jnp.float32), ((0, 0), (0, F_pad - F)))

    # --- advisory cost estimate (gather matmul + 2 linears + rsqrt/row) ------
    flops = (2 * B_pad * R_pad * F_pad          # one-hot gather
             + 2 * B_pad * F_pad * H_pad        # linear 1
             + 2 * B_pad * H_pad * F_pad)       # linear 2
    bytes_accessed = (emb_p.size * 2 + w1_p.size * 2 + w2_p.size * 2
                      + (b1_p.size + b2_p.size) * 4
                      + B_pad * 4                       # class ids
                      + B_pad * F_pad * 2               # gathered-embedding traffic
                      + B_pad * F_pad * 4)              # output
    cost = pl.CostEstimate(flops=int(flops), transcendentals=int(B_pad),
                           bytes_accessed=int(bytes_accessed))

    # --- VMEM budget from actual need (resident blocks are double-buffered by
    # the default pipeline; everything here is tiny so that is harmless) ------
    resident = (emb_p.size * 2 + w1_p.size * 2 + w2_p.size * 2
                + (b1_p.size + b2_p.size) * 4)
    per_tile_io = tile_b * 1 * 4 + tile_b * F_pad * 4            # ids in + out tile
    work = (tile_b * R_pad * 2                                   # one-hot
            + tile_b * F_pad * 4                                 # gathered emb (f32)
            + tile_b * H_pad * 4                                 # hidden
            + tile_b * F_pad * 4)                                # z
    vmem_need = 2 * resident + 2 * per_tile_io + work + (4 << 20)
    vmem_limit = int(min(max(vmem_need, 4 << 20), 64 << 20))     # <=64 MiB fits v7x too

    out_pad = pl.pallas_call(
        _proto_mlp_kernel,
        out_shape=jax.ShapeDtypeStruct((B_pad, F_pad), jnp.float32),
        grid_spec=pltpu.PrefetchScalarGridSpec(
            num_scalar_prefetch=0,
            grid=grid,
            in_specs=[
                pl.BlockSpec((tile_b, 1), lambda i: (i, 0)),          # class ids tile
                pl.BlockSpec((R_pad, F_pad), lambda i: (0, 0)),       # emb table resident
                pl.BlockSpec((F_pad, H_pad), lambda i: (0, 0)),       # w1 resident
                pl.BlockSpec((1, H_pad), lambda i: (0, 0)),           # b1 resident
                pl.BlockSpec((H_pad, F_pad), lambda i: (0, 0)),       # w2 resident
                pl.BlockSpec((1, F_pad), lambda i: (0, 0)),           # b2 resident
            ],
            out_specs=pl.BlockSpec((tile_b, F_pad), lambda i: (i, 0)),
        ),
        compiler_params=pltpu.CompilerParams(
            dimension_semantics=("parallel",),
            vmem_limit_bytes=vmem_limit,
        ),
        cost_estimate=cost,
    )(ids_2d, emb_p, w1_p, b1_p, w2_p, b2_p)

    return out_pad[:B, :F]


def _reference_forward(class_id, emb_table, w1, b1, w2, b2):
    """Pure-JAX f32 reference matching the PyTorch module."""
    class_id = jnp.asarray(class_id, dtype=jnp.int32)
    if class_id.ndim == 0:
        class_id = class_id[None]
    emb = jnp.take(emb_table, class_id, axis=0)
    h = jnp.maximum(emb @ w1 + b1.reshape(1, -1), 0.0)
    z = h @ w2 + b2.reshape(1, -1)
    n = jnp.linalg.norm(z, axis=1, keepdims=True)
    return z / jnp.maximum(n, 1e-12)


def init_params(key, num_classes, server_hidden_dim, feature_dim):
    """Deterministic parameter init mimicking PyTorch defaults."""
    k_emb, k_w1, k_b1, k_w2, k_b2 = jax.random.split(key, 5)
    # nn.Embedding: N(0, 1)
    emb_table = jax.random.normal(k_emb, (num_classes * 3, feature_dim), jnp.float32)
    # nn.Linear: U(-1/sqrt(fan_in), 1/sqrt(fan_in)); weights stored as (in, out)
    lim1 = 1.0 / (feature_dim ** 0.5)
    w1 = jax.random.uniform(k_w1, (feature_dim, server_hidden_dim), jnp.float32, -lim1, lim1)
    b1 = jax.random.uniform(k_b1, (server_hidden_dim,), jnp.float32, -lim1, lim1)
    lim2 = 1.0 / (server_hidden_dim ** 0.5)
    w2 = jax.random.uniform(k_w2, (server_hidden_dim, feature_dim), jnp.float32, -lim2, lim2)
    b2 = jax.random.uniform(k_b2, (feature_dim,), jnp.float32, -lim2, lim2)
    return emb_table, w1, b1, w2, b2


if __name__ == "__main__":
    num_classes = 4
    feature_dim = 32
    server_hidden_dim = 64

    key = jax.random.PRNGKey(0)
    emb_table, w1, b1, w2, b2 = init_params(key, num_classes, server_hidden_dim, feature_dim)

    # batch of class ids (values in [0, num_classes*3))
    class_ids = jnp.array([0, 1, 2, 3, 5, 7, 9, 11], dtype=jnp.int32)

    out = trainable_prototypes_forward(class_ids, emb_table, w1, b1, w2, b2)
    out = jax.block_until_ready(out)
    ref = _reference_forward(class_ids, emb_table, w1, b1, w2, b2)

    assert out.shape == (class_ids.shape[0], feature_dim)
    norms = jnp.linalg.norm(out, axis=1)
    assert bool(jnp.all(jnp.abs(norms - 1.0) < 1e-3)), "rows not unit-norm"
    # bf16 MXU matmuls with f32 accumulation: loose tolerance vs the f32 reference
    assert bool(jnp.max(jnp.abs(out - ref)) < 5e-2), "mismatch vs f32 reference"

    # scalar class_id -> (1, feature_dim), matching the PyTorch unsqueeze(0) branch
    out1 = trainable_prototypes_forward(jnp.int32(5), emb_table, w1, b1, w2, b2)
    out1 = jax.block_until_ready(out1)
    ref1 = _reference_forward(jnp.int32(5), emb_table, w1, b1, w2, b2)
    assert out1.shape == (1, feature_dim)
    assert bool(jnp.max(jnp.abs(out1 - ref1)) < 5e-2), "scalar-path mismatch"

    print("KERNEL_OK")
</pallas_src>

<mosaic_0001>
module attributes {stable_mosaic.version = 11 : i64} {
  func.func @_proto_mlp_kernel(%arg0: i32, %arg1: memref<8x1xi32, #tpu.memory_space<vmem>>, %arg2: memref<16x128xbf16, #tpu.memory_space<vmem>>, %arg3: memref<128x128xbf16, #tpu.memory_space<vmem>>, %arg4: memref<1x128xf32, #tpu.memory_space<vmem>>, %arg5: memref<128x128xbf16, #tpu.memory_space<vmem>>, %arg6: memref<1x128xf32, #tpu.memory_space<vmem>>, %arg7: memref<8x128xf32, #tpu.memory_space<vmem>>) attributes {dimension_semantics = [#tpu.dimension_semantics<parallel>], iteration_bounds = array<i64: 1>, scalar_prefetch = 0 : i64, scratch_operands = 0 : i64, tpu.core_type = #tpu.core_type<tc>, window_params = [{transform_indices = @transform_0, window_bounds = array<i64: 8, 1>}, {pipeline_mode = #tpu.pipeline_mode<synchronous>, transform_indices = @transform_1, window_bounds = array<i64: 16, 128>}, {pipeline_mode = #tpu.pipeline_mode<synchronous>, transform_indices = @transform_2, window_bounds = array<i64: 128, 128>}, {pipeline_mode = #tpu.pipeline_mode<synchronous>, transform_indices = @transform_3, window_bounds = array<i64: 1, 128>}, {pipeline_mode = #tpu.pipeline_mode<synchronous>, transform_indices = @transform_4, window_bounds = array<i64: 128, 128>}, {pipeline_mode = #tpu.pipeline_mode<synchronous>, transform_indices = @transform_5, window_bounds = array<i64: 1, 128>}, {transform_indices = @transform_6, window_bounds = array<i64: 8, 128>}]} {
    %c0 = arith.constant 0 : index
    %c0_0 = arith.constant 0 : index
    %0 = vector.load %arg1[%c0, %c0_0] : memref<8x1xi32, #tpu.memory_space<vmem>>, vector<8x1xi32>
    %1 = tpu.iota {dimensions = array<i32: 1>} : vector<8x16xi32>
    %2 = vector.broadcast %0 : vector<8x1xi32> to vector<8x16xi32>
    %3 = arith.cmpi eq, %1, %2 : vector<8x16xi32>
    %4 = arith.extui %3 : vector<8x16xi1> to vector<8x16xi32>
    %5 = arith.sitofp %4 : vector<8x16xi32> to vector<8x16xf32>
    %6 = arith.truncf %5 : vector<8x16xf32> to vector<8x16xbf16>
    %c0_1 = arith.constant 0 : index
    %c0_2 = arith.constant 0 : index
    %7 = vector.load %arg2[%c0_1, %c0_2] : memref<16x128xbf16, #tpu.memory_space<vmem>>, vector<16x128xbf16>
    %cst = arith.constant dense<0.000000e+00> : vector<8x128xf32>
    %8 = tpu.matmul %6, %7, %cst {dimension_numbers = #tpu.dot_dimension_numbers<[1], [0], [0], [1], [0, 0, 1, 1], [], []>} : vector<8x16xbf16>, vector<16x128xbf16>, vector<8x128xf32> -> vector<8x128xf32>
    %9 = arith.truncf %8 : vector<8x128xf32> to vector<8x128xbf16>
    %c0_3 = arith.constant 0 : index
    %c0_4 = arith.constant 0 : index
    %10 = vector.load %arg3[%c0_3, %c0_4] : memref<128x128xbf16, #tpu.memory_space<vmem>>, vector<128x128xbf16>
    %cst_5 = arith.constant dense<0.000000e+00> : vector<8x128xf32>
    %11 = tpu.matmul %9, %10, %cst_5 {dimension_numbers = #tpu.dot_dimension_numbers<[1], [0], [0], [1], [0, 0, 1, 1], [], []>} : vector<8x128xbf16>, vector<128x128xbf16>, vector<8x128xf32> -> vector<8x128xf32>
    %c0_6 = arith.constant 0 : index
    %c0_7 = arith.constant 0 : index
    %12 = vector.load %arg4[%c0_6, %c0_7] : memref<1x128xf32, #tpu.memory_space<vmem>>, vector<1x128xf32>
    %13 = vector.broadcast %12 : vector<1x128xf32> to vector<8x128xf32>
    %14 = arith.addf %11, %13 : vector<8x128xf32>
    %cst_8 = arith.constant 0.000000e+00 : f32
    %15 = vector.broadcast %cst_8 : f32 to vector<8x128xf32>
    %16 = arith.maximumf %14, %15 : vector<8x128xf32>
    %17 = arith.truncf %16 : vector<8x128xf32> to vector<8x128xbf16>
    %c0_9 = arith.constant 0 : index
    %c0_10 = arith.constant 0 : index
    %18 = vector.load %arg5[%c0_9, %c0_10] : memref<128x128xbf16, #tpu.memory_space<vmem>>, vector<128x128xbf16>
    %cst_11 = arith.constant dense<0.000000e+00> : vector<8x128xf32>
    %19 = tpu.matmul %17, %18, %cst_11 {dimension_numbers = #tpu.dot_dimension_numbers<[1], [0], [0], [1], [0, 0, 1, 1], [], []>} : vector<8x128xbf16>, vector<128x128xbf16>, vector<8x128xf32> -> vector<8x128xf32>
    %c0_12 = arith.constant 0 : index
    %c0_13 = arith.constant 0 : index
    %20 = vector.load %arg6[%c0_12, %c0_13] : memref<1x128xf32, #tpu.memory_space<vmem>>, vector<1x128xf32>
    %21 = vector.broadcast %20 : vector<1x128xf32> to vector<8x128xf32>
    %22 = arith.addf %19, %21 : vector<8x128xf32>
    %23 = arith.mulf %22, %22 : vector<8x128xf32>
    %cst_14 = arith.constant dense<0.000000e+00> : vector<8xf32>
    %24 = vector.multi_reduction <add>, %23, %cst_14 [1] : vector<8x128xf32> to vector<8xf32>
    %25 = vector.shape_cast %24 : vector<8xf32> to vector<8x1xf32>
    %cst_15 = arith.constant 1.000000e-24 : f32
    %26 = vector.broadcast %cst_15 : f32 to vector<8x1xf32>
    %27 = arith.maximumf %25, %26 : vector<8x1xf32>
    %28 = math.rsqrt %27 : vector<8x1xf32>
    %29 = vector.broadcast %28 : vector<8x1xf32> to vector<8x128xf32>
    %30 = arith.mulf %22, %29 : vector<8x128xf32>
    %c0_16 = arith.constant 0 : index
    %c0_17 = arith.constant 0 : index
    %31 = vector.load %arg7[%c0_16, %c0_17] : memref<8x128xf32, #tpu.memory_space<vmem>>, vector<8x128xf32>
    tpu.vector_store %arg7[%c0_16, %c0_17], %30 {strides = array<i32>} : memref<8x128xf32, #tpu.memory_space<vmem>>, vector<8x128xf32>,
    return
  }
  func.func @transform_0(%arg0: i32) -> (i32, i32) {
    %c0_i32 = arith.constant 0 : i32
    %c0_i32_0 = arith.constant 0 : i32
    return %arg0, %c0_i32 : i32, i32
  }
  func.func @transform_1(%arg0: i32) -> (i32, i32) {
    %c0_i32 = arith.constant 0 : i32
    %c0_i32_0 = arith.constant 0 : i32
    %c0_i32_1 = arith.constant 0 : i32
    return %c0_i32, %c0_i32_0 : i32, i32
  }
  func.func @transform_2(%arg0: i32) -> (i32, i32) {
    %c0_i32 = arith.constant 0 : i32
    %c0_i32_0 = arith.constant 0 : i32
    %c0_i32_1 = arith.constant 0 : i32
    return %c0_i32, %c0_i32_0 : i32, i32
  }
  func.func @transform_3(%arg0: i32) -> (i32, i32) {
    %c0_i32 = arith.constant 0 : i32
    %c0_i32_0 = arith.constant 0 : i32
    %c0_i32_1 = arith.constant 0 : i32
    return %c0_i32, %c0_i32_0 : i32, i32
  }
  func.func @transform_4(%arg0: i32) -> (i32, i32) {
    %c0_i32 = arith.constant 0 : i32
    %c0_i32_0 = arith.constant 0 : i32
    %c0_i32_1 = arith.constant 0 : i32
    return %c0_i32, %c0_i32_0 : i32, i32
  }
  func.func @transform_5(%arg0: i32) -> (i32, i32) {
    %c0_i32 = arith.constant 0 : i32
    %c0_i32_0 = arith.constant 0 : i32
    %c0_i32_1 = arith.constant 0 : i32
    return %c0_i32, %c0_i32_0 : i32, i32
  }
  func.func @transform_6(%arg0: i32) -> (i32, i32) {
    %c0_i32 = arith.constant 0 : i32
    %c0_i32_0 = arith.constant 0 : i32
    return %arg0, %c0_i32 : i32, i32
  }
}

</mosaic_0001>

<bundles_post_ra>
// kernel: tpu_custom_call.1
= control target key start
LH: loop header
LB: loop body
LE: loop exit
PB: predicated region body
PF: predicated region fallthrough
CT: control target
= control target key end

     0   :  { %11 = vsyncpa [#allocation3], 0  ;;  %s531_s0 = inlined_call_operand.vmem [shape: s32[8,1], index: 0, kind: input, shape index: {}]   ;;  %s532_s1 = inlined_call_operand.vmem [shape: bf16[16,128], index: 1, kind: input, shape index: {}]   ;;  %s533_s2 = inlined_call_operand.hbm [shape: bf16[128,128], index: 2, kind: input, shape index: {}]   ;;  %s534_s3 = inlined_call_operand.vmem [shape: f32[1,128], index: 3, kind: input, shape index: {}]   ;;  %s535_s4 = inlined_call_operand.hbm [shape: bf16[128,128], index: 4, kind: input, shape index: {}]   ;;  %s536_s5 = inlined_call_operand.vmem [shape: f32[1,128], index: 5, kind: input, shape index: {}]   ;;  %s537_s6 = inlined_call_operand.hbm [shape: f32[8,128], index: 6, kind: output, shape index: {}]  }
   0x1   :  { %12 = vsyncpa [#allocation6], 0 }
   0x2   :  { %13 = vsyncpa [#allocation4], 0  ;;  %s22_s23 = sshll.u32 %s533_s2, 4  ;;  %s468_s24 = smov [#allocation2]   ;;  %s23_s23 = int_to_ptr.hbm [resolvable:$true] %s22_s23 }
   0x3   :  { %s24_s25 = sshll.u32 %s468_s24, 4  ;;  %s37_s28 = sshll.u32 %s535_s4, 4  ;;  %s25_s25 = int_to_ptr.vmem [resolvable:$true] %s24_s25  ;;  %s38_s28 = int_to_ptr.hbm [resolvable:$true] %s37_s28 }
   0x4   :  { %s469_s29 = smov 64   ;;  %s470_s30 = smov 4  }
   0x5   :  { %30 = dma.hbm_to_vmem [thread:$0]  %s23_s23, 1024, %s25_s25, [#allocation3], %s469_s29, %s469_s29, %s470_s30  }
   0x6   :  { %s471_s7 = smov [#allocation5]  }
   0x7   :  { %s39_s8 = sshll.u32 %s471_s7, 4  ;;  %s40_s8 = int_to_ptr.vmem [resolvable:$true] %s39_s8 }
   0x8   :  { %45 = dma.hbm_to_vmem [thread:$0]  %s38_s28, 1024, %s40_s8, [#allocation6], %s469_s29, %s469_s29, %s470_s30  }
   0x9   :  { %462 = dma.done.wait [#allocation3], 1024  }
   0xa   :  { %463 = vsyncadd [#allocation3], 4294966272 }
   0xb   :  { %464 = dma.done.wait [#allocation6], 1024  }
   0xc   :  { %465 = vsyncadd [#allocation6], 4294966272  ;;  %v472_v0 = vmov 0   ;;  %v57_v1 = vld [vmem:[%s531_s0] sm:$0xff]  ;;  %v369_v3 = vld [vmem:[#allocation2 + $0x38] sm:$0xff]  ;;  %v58_v9 = vlaneseq  ;;  %v473_v13 = vmov 0.0  }
   0xd   :  { %385 = vset.pattern.permute.xlu0 %v472_v0  ;;  %v361_v2 = vld [vmem:[%s532_s1] sm:$0xff]  ;;  %161 = vmatpush.bf16.msra.mxu1 %v369_v3  ;;  %v368_v4 = vld [vmem:[#allocation2 + $0x30] sm:$0xff]  ;;  %v367_v5 = vld [vmem:[#allocation2 + $0x28] sm:$0xff]  ;;  %vm75_vm1 = vcmask 130048   ;;  %s280_s15 = sshll.u32 %s537_s6, 4  ;;  %s281_s15 = int_to_ptr.hbm [resolvable:$true] %s280_s15 }
   0xe   :  { %61 = vperm.xlu0 %385, %v57_v1   ;;  %86 = vmatpush.bf16.msra.mxu0 %v361_v2  ;;  %v366_v6 = vld [vmem:[#allocation2 + $0x20] sm:$0xff]  ;;  %v365_v7 = vld [vmem:[#allocation2 + $0x18] sm:$0xff]  ;;  %v364_v8 = vld [vmem:[#allocation2 + $0x10] sm:$0xff]  ;;  %v59_v11 = vand.u32 127, %v58_v9 }
   0xf   :  { %v363_v10 = vld [vmem:[#allocation2 + $0x8] sm:$0xff]  ;;  %v362_v16 = vld [vmem:[#allocation2] sm:$0xff]  ;;  %v377_v17 = vld [vmem:[#allocation5 + $0x38] sm:$0xff] }
  0x10   :  { %244 = vmatpush.bf16.msra.mxu2 %v377_v17  ;;  %v376_v18 = vld [vmem:[#allocation5 + $0x30] sm:$0xff]  ;;  %v375_v19 = vld [vmem:[#allocation5 + $0x28] sm:$0xff]  ;;  %v374_v20 = vld [vmem:[#allocation5 + $0x20] sm:$0xff] }
  0x11   :  { %162 = vmatpush.bf16.msra.mxu1 %v368_v4  ;;  %v373_v21 = vld [vmem:[#allocation5 + $0x18] sm:$0xff]  ;;  %v372_v22 = vld [vmem:[#allocation5 + $0x10] sm:$0xff]  ;;  %v371_v26 = vld [vmem:[#allocation5 + $0x8] sm:$0xff] }
  0x12   :  { %v370_v27 = vld [vmem:[#allocation5] sm:$0xff] }
  0x13   :  { %v386_v28 = vld [vmem:[%s534_s3] ss:$0 sm:$0xff]  ;;  %s474_s3 = smov [#allocation7]  }
  0x14   :  { %245 = vmatpush.bf16.msra.mxu2 %v376_v18  ;;  %v387_v34 = vld [vmem:[%s536_s5] ss:$0 sm:$0xff]  ;;  %s278_s13 = sshll.u32 %s474_s3, 4  ;;  %s279_s13 = int_to_ptr.vmem [resolvable:$true] %s278_s13 }
  0x15   :  { %163 = vmatpush.bf16.msra.mxu1 %v367_v5 }
  0x18   :  { %246 = vmatpush.bf16.msra.mxu2 %v375_v19 }
  0x19   :  { %164 = vmatpush.bf16.msra.mxu1 %v366_v6 }
  0x1c   :  { %247 = vmatpush.bf16.msra.mxu2 %v374_v20 }
  0x1d   :  { %165 = vmatpush.bf16.msra.mxu1 %v365_v7 }
  0x20   :  { %248 = vmatpush.bf16.msra.mxu2 %v373_v21 }
  0x21   :  { %166 = vmatpush.bf16.msra.mxu1 %v364_v8 }
  0x24   :  { %249 = vmatpush.bf16.msra.mxu2 %v372_v22 }
  0x25   :  { %167 = vmatpush.bf16.msra.mxu1 %v363_v10 }
  0x28   :  { %250 = vmatpush.bf16.msra.mxu2 %v371_v26 }
  0x29   :  { %168 = vmatpush.bf16.msra.mxu1 %v362_v16 }
  0x2c   :  { %251 = vmatpush.bf16.msra.mxu2 %v370_v27 }
  0x80   :  { %v62_v12 = vpop.permute.xlu0 %61 }
  0x81   :  { %vm63_vm0 = vcmp.eq.s32.totalorder %v59_v11, %v62_v12 }
  0x82   :  { %v291_v14 = vsel %vm63_vm0, 1.0, %v473_v13 }
  0x83   :  { %v66_v15 = vpack.c.bf16 %v291_v14, %v291_v14 }
  0x85   :  { %296 = vmatmul.msk.bf16.vlgmr.msra.gmra.mxu0 %vm75_vm1, %v66_v15 }
 0x102   :  { %v88_v23 = vpop.f32.mrf.mxu0 }
 0x103   :  { %v92_v24 = vpack.c.bf16 %v88_v23, %v88_v23 }
 0x105   :  { %169 = vmatmul.bf16.vlgmr.msra.gmra.mxu1 %v92_v24 }
 0x10a   :  { %v90_v25 = vpop.f32.mrf.mxu0 }
 0x182   :  { %v170_v29 = vpop.f32.mrf.mxu1 }
 0x183   :  { %v171_v30 = vadd.f32 %v386_v28, %v170_v29 }
 0x185   :  { %v174_v31 = vmax.f32 %v171_v30, 0.0 }
 0x187   :  { %v175_v32 = vpack.c.bf16 %v174_v31, %v174_v31 }
 0x189   :  { %252 = vmatmul.bf16.vlgmr.msra.gmra.mxu2 %v175_v32 }
 0x18a   :  { %v172_v33 = vpop.f32.mrf.mxu1 }
 0x20c   :  { %v253_v35 = vpop.f32.mrf.mxu2 }
 0x20d   :  { %v254_v36 = vadd.f32 %v387_v34, %v253_v35 }
 0x20f   :  { %v257_v37 = vmul.f32 %v254_v36, %v254_v36 }
 0x211   :  { %258 = vadd.xlane.f32.xlu0 %v257_v37 }
 0x214   :  { %v255_v38 = vpop.f32.mrf.mxu2 }
 0x284   :  { %v259_v39 = vpop.xlane.xlu0 %258 }
 0x285   :  { %v260_v40 = vmax.f32 %v259_v39, 1e-24 }
 0x287   :  { %388 = vrsqrt.f32 %v260_v40  ;;  %vm267_vm3 = vweird.f32 %v260_v40 }
 0x28d   :  { %v389_v41 = vpop.eup %388 }
 0x28e   :  { %v262_v42 = vmul.f32 %v389_v41, %v260_v40  ;;  %vm268_vm2 = vweird.f32 %v389_v41 }
 0x28f   :  { %vm269_vm4 = vmor %vm267_vm3, %vm268_vm2 }
 0x290   :  { %v263_v43 = vmul.f32 %v389_v41, %v262_v42 }
 0x292   :  { %v264_v44 = vmul.f32 0.5, %v263_v43 }
 0x294   :  { %v265_v45 = vsub.f32 1.5, %v264_v44 }
 0x296   :  { %v266_v46 = vmul.f32 %v389_v41, %v265_v45 }
 0x298   :  { %v270_v47 = vsel %vm269_vm4, %v389_v41, %v266_v46 }
 0x299   :  { %v271_v48 = vmul.f32 %v270_v47, %v254_v36 }
 0x29b   :  { %272 = vst [vmem:[#allocation7] sm:$0xff] %v271_v48 }
 0x29c   :  { %283 = dma.vmem_to_hbm [thread:$0]  %s279_s13, 128, %s281_s15, [#allocation4]  }
 0x29d   :  { %466 = dma.done.wait [#allocation4], 128  }
 0x29e   :  { %467 = vsyncadd [#allocation4], 4294967168 }
 0x29f   :  { %288 = vsyncpa [#allocation3], 1 }
 0x2a0   :  { %289 = vsyncpa [#allocation6], 1 }
 0x2a1   :  { %290 = vsyncpa [#allocation4], 1 }

</bundles_post_ra>
